<compile_context>
chip_gen: v5e
topology: v5e:2x2
jax: 0.10.0
libtpu: 0.0.40
codegen_flags: <defaults>
</compile_context>

<pallas_src>
import functools

import jax
import jax.numpy as jnp
from jax import lax
from jax.experimental import pallas as pl
from jax.experimental.pallas import tpu as pltpu


TILE_R_MAX = 2048                       # max rows (of 128 lanes) per grid step
_VMEM_INPUT_BUDGET = 8 * 1024 * 1024    # budget for double-buffered input blocks


def _dice_sums_kernel(s_ref, t_ref, o_ref, *, spatial, tile_r, n_classes,
                      fuse_softmax, need_mask):
    """Accumulate per-(batch, class) partial sums of s*t, s*s, t*t.

    s_ref: (1, C_in, tile_r, 128)       inputs tile (C_in = C if fused softmax,
                                        else n_classes), native dtype.
    t_ref: (1, n_classes, tile_r, 128)  target tile, native dtype.
    o_ref: (1, n_classes, 3, 8, 128)    f32 accumulator, resident across the
                                        innermost ("arbitrary") grid axis.
    """
    j = pl.program_id(1)

    @pl.when(j == 0)
    def _init():
        o_ref[...] = jnp.zeros_like(o_ref)

    x = s_ref[0].astype(jnp.float32)      # (C_in, tile_r, 128)
    t = t_ref[0].astype(jnp.float32)      # (n_classes, tile_r, 128)

    if fuse_softmax:
        # Channel softmax fused into the kernel.  Channel is a leading
        # (non-vreg) axis, so max/sum over it are plain VPU ops; exp -> EUP.
        m = x.max(axis=0, keepdims=True)
        e = jnp.exp(x - m)                # (C_in, tile_r, 128)
        inv = 1.0 / e.sum(axis=0)         # (tile_r, 128): one divide per pos.

    if need_mask:
        # Exact flat-element mask: covers both the host zero-pad lanes and the
        # Pallas out-of-range rows of the last partial tile (VPU-only work).
        ridx = lax.broadcasted_iota(jnp.int32, (tile_r, 128), 0)
        lidx = lax.broadcasted_iota(jnp.int32, (tile_r, 128), 1)
        valid = (j * (tile_r * 128) + ridx * 128 + lidx) < spatial

    fold = tile_r // 8
    for i in range(n_classes):            # n_classes <= 2: static unroll
        s_c = e[i] * inv if fuse_softmax else x[i]     # (tile_r, 128)
        t_c = t[i]
        if need_mask:
            s_c = jnp.where(valid, s_c, 0.0)
            t_c = jnp.where(valid, t_c, 0.0)
        # Sublane-aligned fold (tile_r,128) -> (fold,8,128); the axis-0 sum is
        # straight VPU adds (no XLU tree in the hot loop).
        st = (s_c * t_c).reshape(fold, 8, 128).sum(axis=0)
        ss = (s_c * s_c).reshape(fold, 8, 128).sum(axis=0)
        tt = (t_c * t_c).reshape(fold, 8, 128).sum(axis=0)
        o_ref[0, i, 0, :, :] += st        # intersect
        o_ref[0, i, 1, :, :] += ss        # z_sum
        o_ref[0, i, 2, :, :] += tt        # y_sum


def _per_class_sums(x, y, spatial, n_classes, fuse_softmax):
    """x: (B, C, rows, 128); y: (B, Cy, rows, 128) -> (n_classes, 3) f32 sums."""
    b, c, rows, _ = x.shape
    c_in = c if fuse_softmax else n_classes

    # Biggest row-tile that keeps the double-buffered input blocks in budget.
    bpe = max(jnp.dtype(x.dtype).itemsize, jnp.dtype(y.dtype).itemsize)
    per_row = 2 * (c_in + n_classes) * 128 * bpe
    tile_r = max(8, min(TILE_R_MAX, _VMEM_INPUT_BUDGET // per_row))
    tile_r = (tile_r // 8) * 8
    tile_r = min(tile_r, ((rows + 7) // 8) * 8)

    n_tiles = pl.cdiv(rows, tile_r)
    need_mask = (spatial % (tile_r * 128)) != 0

    kernel = functools.partial(
        _dice_sums_kernel, spatial=spatial, tile_r=tile_r, n_classes=n_classes,
        fuse_softmax=fuse_softmax, need_mask=need_mask)

    partials = pl.pallas_call(
        kernel,
        out_shape=jax.ShapeDtypeStruct((b, n_classes, 3, 8, 128), jnp.float32),
        grid=(b, n_tiles),
        in_specs=[
            pl.BlockSpec((1, c_in, tile_r, 128), lambda bb, j: (bb, 0, j, 0)),
            pl.BlockSpec((1, n_classes, tile_r, 128), lambda bb, j: (bb, 0, j, 0)),
        ],
        out_specs=pl.BlockSpec((1, n_classes, 3, 8, 128),
                               lambda bb, j: (bb, 0, 0, 0, 0)),
        compiler_params=pltpu.CompilerParams(
            dimension_semantics=("parallel", "arbitrary"),
            vmem_limit_bytes=32 * 1024 * 1024),
    )(x, y)

    # Tiny final cross-lane + batch reduce in plain JAX.
    return partials.sum(axis=(0, 3, 4))  # (n_classes, 3)


@functools.partial(jax.jit, static_argnames=("n_classes", "alpha", "softmax"))
def dice_loss(inputs, target, n_classes=1, alpha=0.5, softmax=False):
    """JAX/Pallas equivalent of DiceLoss.forward(inputs, target, softmax)."""
    assert inputs.shape == target.shape, (
        f"predict {inputs.shape} & target {target.shape} shape do not match")
    assert n_classes <= 2, "weight = [alpha, 1-alpha] only supports n_classes <= 2"
    assert inputs.shape[1] >= n_classes

    b, c = inputs.shape[0], inputs.shape[1]
    spatial = 1
    for d in inputs.shape[2:]:
        spatial *= d

    # Zero-copy contiguous reshape; pad spatial to a multiple of 128 only if
    # needed (padded values are masked exactly inside the kernel).
    x = inputs.reshape(b, c, spatial)
    y = target.reshape(b, c, spatial)
    rem = spatial % 128
    if rem:
        # Pad materializes a copy, so first drop channel planes the kernel
        # will never read.
        if (not softmax) and c > n_classes:
            x = x[:, :n_classes]
        if c > n_classes:
            y = y[:, :n_classes]
        pad = 128 - rem
        x = jnp.pad(x, ((0, 0), (0, 0), (0, pad)))
        y = jnp.pad(y, ((0, 0), (0, 0), (0, pad)))
    rows = x.shape[-1] // 128
    x = x.reshape(x.shape[0], x.shape[1], rows, 128)
    y = y.reshape(y.shape[0], y.shape[1], rows, 128)

    sums = _per_class_sums(x, y, spatial, n_classes, bool(softmax))
    intersect, z_sum, y_sum = sums[:, 0], sums[:, 1], sums[:, 2]

    smooth = 1e-05
    dice = 1.0 - (2.0 * intersect + smooth) / (z_sum + y_sum + smooth)

    weight = jnp.array([alpha, 1.0 - alpha], dtype=jnp.float32)[:n_classes]
    loss = jnp.sum(dice * weight) / n_classes
    return loss


def _reference(inputs, target, n_classes=1, alpha=0.5, softmax=False):
    if softmax:
        inputs = jax.nn.softmax(inputs, axis=1)
    weight = [alpha, 1.0 - alpha]
    smooth = 1e-05
    loss = 0.0
    for i in range(n_classes):
        s = inputs[:, i].astype(jnp.float32)
        t = target[:, i].astype(jnp.float32)
        intersect = jnp.sum(s * t)
        y_sum = jnp.sum(t * t)
        z_sum = jnp.sum(s * s)
        dice = 1.0 - (2.0 * intersect + smooth) / (z_sum + y_sum + smooth)
        loss = loss + dice * weight[i]
    return loss / n_classes


if __name__ == "__main__":
    key = jax.random.PRNGKey(0)
    k1, k2, k3, k4, k5, k6 = jax.random.split(key, 6)

    # Case 1: module defaults (n_classes=1), spatial divisible by 128.
    B, C, H, W = 2, 1, 16, 16
    inputs1 = jax.nn.sigmoid(jax.random.normal(k1, (B, C, H, W), dtype=jnp.float32))
    target1 = (jax.random.uniform(k2, (B, C, H, W)) > 0.5).astype(jnp.float32)
    out1 = jax.block_until_ready(dice_loss(inputs1, target1, n_classes=1,
                                           alpha=0.5, softmax=False))
    ref1 = _reference(inputs1, target1, n_classes=1, alpha=0.5, softmax=False)
    assert jnp.allclose(out1, ref1, rtol=2e-5, atol=1e-6), (out1, ref1)

    # Case 2: two classes, fused softmax, spatial NOT divisible by 128
    # (exercises the host pad + exact flat-index mask paths).
    B2, C2, H2, W2 = 2, 2, 24, 24
    inputs2 = jax.random.normal(k3, (B2, C2, H2, W2), dtype=jnp.float32)
    target2 = (jax.random.uniform(k4, (B2, C2, H2, W2)) > 0.5).astype(jnp.float32)
    out2 = jax.block_until_ready(dice_loss(inputs2, target2, n_classes=2,
                                           alpha=0.5, softmax=True))
    ref2 = _reference(inputs2, target2, n_classes=2, alpha=0.5, softmax=True)
    assert jnp.allclose(out2, ref2, rtol=2e-5, atol=1e-6), (out2, ref2)

    # Case 3: C > n_classes, no softmax, fully tile-aligned spatial
    # (exercises the unmasked, zero-copy, partial-channel-read path).
    B3, C3, H3, W3 = 2, 4, 32, 32
    inputs3 = jax.nn.sigmoid(jax.random.normal(k5, (B3, C3, H3, W3), dtype=jnp.float32))
    target3 = (jax.random.uniform(k6, (B3, C3, H3, W3)) > 0.5).astype(jnp.float32)
    out3 = jax.block_until_ready(dice_loss(inputs3, target3, n_classes=2,
                                           alpha=0.3, softmax=False))
    ref3 = _reference(inputs3, target3, n_classes=2, alpha=0.3, softmax=False)
    assert jnp.allclose(out3, ref3, rtol=2e-5, atol=1e-6), (out3, ref3)

    print("KERNEL_OK")
</pallas_src>

<mosaic_0001>
module attributes {stable_mosaic.version = 11 : i64} {
  func.func @_dice_sums_kernel(%arg0: i32, %arg1: i32, %arg2: memref<1x1x8x128xf32, #tpu.memory_space<vmem>>, %arg3: memref<1x1x8x128xf32, #tpu.memory_space<vmem>>, %arg4: memref<1x1x3x8x128xf32, #tpu.memory_space<vmem>>) attributes {dimension_semantics = [#tpu.dimension_semantics<parallel>, #tpu.dimension_semantics<arbitrary>], iteration_bounds = array<i64: 2, 1>, scalar_prefetch = 0 : i64, scratch_operands = 0 : i64, tpu.core_type = #tpu.core_type<tc>, window_params = [{transform_indices = @transform_0, window_bounds = array<i64: 1, 1, 8, 128>}, {transform_indices = @transform_1, window_bounds = array<i64: 1, 1, 8, 128>}, {transform_indices = @transform_2, window_bounds = array<i64: 1, 1, 3, 8, 128>}]} {
    %c0_i32 = arith.constant 0 : i32
    %0 = arith.cmpi eq, %arg1, %c0_i32 : i32
    %1 = arith.extui %0 : i1 to i32
    %c0_i32_0 = arith.constant 0 : i32
    %2 = arith.cmpi ne, %1, %c0_i32_0 : i32
    scf.if %2 {
      %cst_40 = arith.constant 0.000000e+00 : f32
      %50 = vector.broadcast %cst_40 : f32 to vector<1x1x3x8x128xf32>
      %c0_41 = arith.constant 0 : index
      %c0_42 = arith.constant 0 : index
      %c0_43 = arith.constant 0 : index
      %c0_44 = arith.constant 0 : index
      %c0_45 = arith.constant 0 : index
      %51 = vector.load %arg4[%c0_41, %c0_42, %c0_43, %c0_44, %c0_45] : memref<1x1x3x8x128xf32, #tpu.memory_space<vmem>>, vector<1x1x3x8x128xf32>
      tpu.vector_store %arg4[%c0_41, %c0_42, %c0_43, %c0_44, %c0_45], %50 {strides = array<i32>} : memref<1x1x3x8x128xf32, #tpu.memory_space<vmem>>, vector<1x1x3x8x128xf32>,
    } else {
    }
    %c0 = arith.constant 0 : index
    %c0_1 = arith.constant 0 : index
    %c0_2 = arith.constant 0 : index
    %c0_3 = arith.constant 0 : index
    %3 = vector.load %arg2[%c0, %c0_1, %c0_2, %c0_3] : memref<1x1x8x128xf32, #tpu.memory_space<vmem>>, vector<1x1x8x128xf32>
    %4 = vector.shape_cast %3 : vector<1x1x8x128xf32> to vector<1x8x128xf32>
    %c0_4 = arith.constant 0 : index
    %c0_5 = arith.constant 0 : index
    %c0_6 = arith.constant 0 : index
    %c0_7 = arith.constant 0 : index
    %5 = vector.load %arg3[%c0_4, %c0_5, %c0_6, %c0_7] : memref<1x1x8x128xf32, #tpu.memory_space<vmem>>, vector<1x1x8x128xf32>
    %6 = vector.shape_cast %5 : vector<1x1x8x128xf32> to vector<1x8x128xf32>
    %7 = tpu.iota {dimensions = array<i32: 0>} : vector<8x128xi32>
    %8 = tpu.iota {dimensions = array<i32: 1>} : vector<8x128xi32>
    %c1024_i32 = arith.constant 1024 : i32
    %9 = arith.muli %arg1, %c1024_i32 : i32
    %c128_i32 = arith.constant 128 : i32
    %10 = vector.broadcast %c128_i32 : i32 to vector<8x128xi32>
    %11 = arith.muli %7, %10 : vector<8x128xi32>
    %12 = vector.broadcast %9 : i32 to vector<8x128xi32>
    %13 = arith.addi %12, %11 : vector<8x128xi32>
    %14 = arith.addi %13, %8 : vector<8x128xi32>
    %c256_i32 = arith.constant 256 : i32
    %15 = vector.broadcast %c256_i32 : i32 to vector<8x128xi32>
    %16 = arith.cmpi slt, %14, %15 : vector<8x128xi32>
    %17 = vector.shape_cast %4 : vector<1x8x128xf32> to vector<8x128xf32>
    %18 = vector.shape_cast %6 : vector<1x8x128xf32> to vector<8x128xf32>
    %cst = arith.constant 0.000000e+00 : f32
    %19 = vector.broadcast %cst : f32 to vector<8x128xf32>
    %20 = arith.select %16, %17, %19 : vector<8x128xi1>, vector<8x128xf32>
    %cst_8 = arith.constant 0.000000e+00 : f32
    %21 = vector.broadcast %cst_8 : f32 to vector<8x128xf32>
    %22 = arith.select %16, %18, %21 : vector<8x128xi1>, vector<8x128xf32>
    %23 = arith.mulf %20, %22 : vector<8x128xf32>
    %24 = vector.shape_cast %23 : vector<8x128xf32> to vector<1x8x128xf32>
    %cst_9 = arith.constant dense<0.000000e+00> : vector<8x128xf32>
    %25 = vector.multi_reduction <add>, %24, %cst_9 [0] : vector<1x8x128xf32> to vector<8x128xf32>
    %26 = arith.mulf %20, %20 : vector<8x128xf32>
    %27 = vector.shape_cast %26 : vector<8x128xf32> to vector<1x8x128xf32>
    %cst_10 = arith.constant dense<0.000000e+00> : vector<8x128xf32>
    %28 = vector.multi_reduction <add>, %27, %cst_10 [0] : vector<1x8x128xf32> to vector<8x128xf32>
    %29 = arith.mulf %22, %22 : vector<8x128xf32>
    %30 = vector.shape_cast %29 : vector<8x128xf32> to vector<1x8x128xf32>
    %cst_11 = arith.constant dense<0.000000e+00> : vector<8x128xf32>
    %31 = vector.multi_reduction <add>, %30, %cst_11 [0] : vector<1x8x128xf32> to vector<8x128xf32>
    %c0_12 = arith.constant 0 : index
    %c0_13 = arith.constant 0 : index
    %c0_14 = arith.constant 0 : index
    %c0_15 = arith.constant 0 : index
    %c0_16 = arith.constant 0 : index
    %32 = vector.load %arg4[%c0_12, %c0_13, %c0_14, %c0_15, %c0_16] : memref<1x1x3x8x128xf32, #tpu.memory_space<vmem>>, vector<1x1x1x8x128xf32>
    %33 = vector.shape_cast %32 : vector<1x1x1x8x128xf32> to vector<8x128xf32>
    %34 = arith.addf %33, %25 : vector<8x128xf32>
    %c0_17 = arith.constant 0 : index
    %c0_18 = arith.constant 0 : index
    %c0_19 = arith.constant 0 : index
    %c0_20 = arith.constant 0 : index
    %c0_21 = arith.constant 0 : index
    %35 = vector.load %arg4[%c0_17, %c0_18, %c0_19, %c0_20, %c0_21] : memref<1x1x3x8x128xf32, #tpu.memory_space<vmem>>, vector<1x1x1x8x128xf32>
    %36 = vector.shape_cast %35 : vector<1x1x1x8x128xf32> to vector<8x128xf32>
    %37 = vector.shape_cast %34 : vector<8x128xf32> to vector<1x1x1x8x128xf32>
    tpu.vector_store %arg4[%c0_17, %c0_18, %c0_19, %c0_20, %c0_21], %37 {strides = array<i32>} : memref<1x1x3x8x128xf32, #tpu.memory_space<vmem>>, vector<1x1x1x8x128xf32>,
    %c0_22 = arith.constant 0 : index
    %c0_23 = arith.constant 0 : index
    %c1 = arith.constant 1 : index
    %c0_24 = arith.constant 0 : index
    %c0_25 = arith.constant 0 : index
    %38 = vector.load %arg4[%c0_22, %c0_23, %c1, %c0_24, %c0_25] : memref<1x1x3x8x128xf32, #tpu.memory_space<vmem>>, vector<1x1x1x8x128xf32>
    %39 = vector.shape_cast %38 : vector<1x1x1x8x128xf32> to vector<8x128xf32>
    %40 = arith.addf %39, %28 : vector<8x128xf32>
    %c0_26 = arith.constant 0 : index
    %c0_27 = arith.constant 0 : index
    %c1_28 = arith.constant 1 : index
    %c0_29 = arith.constant 0 : index
    %c0_30 = arith.constant 0 : index
    %41 = vector.load %arg4[%c0_26, %c0_27, %c1_28, %c0_29, %c0_30] : memref<1x1x3x8x128xf32, #tpu.memory_space<vmem>>, vector<1x1x1x8x128xf32>
    %42 = vector.shape_cast %41 : vector<1x1x1x8x128xf32> to vector<8x128xf32>
    %43 = vector.shape_cast %40 : vector<8x128xf32> to vector<1x1x1x8x128xf32>
    tpu.vector_store %arg4[%c0_26, %c0_27, %c1_28, %c0_29, %c0_30], %43 {strides = array<i32>} : memref<1x1x3x8x128xf32, #tpu.memory_space<vmem>>, vector<1x1x1x8x128xf32>,
    %c0_31 = arith.constant 0 : index
    %c0_32 = arith.constant 0 : index
    %c2 = arith.constant 2 : index
    %c0_33 = arith.constant 0 : index
    %c0_34 = arith.constant 0 : index
    %44 = vector.load %arg4[%c0_31, %c0_32, %c2, %c0_33, %c0_34] : memref<1x1x3x8x128xf32, #tpu.memory_space<vmem>>, vector<1x1x1x8x128xf32>
    %45 = vector.shape_cast %44 : vector<1x1x1x8x128xf32> to vector<8x128xf32>
    %46 = arith.addf %45, %31 : vector<8x128xf32>
    %c0_35 = arith.constant 0 : index
    %c0_36 = arith.constant 0 : index
    %c2_37 = arith.constant 2 : index
    %c0_38 = arith.constant 0 : index
    %c0_39 = arith.constant 0 : index
    %47 = vector.load %arg4[%c0_35, %c0_36, %c2_37, %c0_38, %c0_39] : memref<1x1x3x8x128xf32, #tpu.memory_space<vmem>>, vector<1x1x1x8x128xf32>
    %48 = vector.shape_cast %47 : vector<1x1x1x8x128xf32> to vector<8x128xf32>
    %49 = vector.shape_cast %46 : vector<8x128xf32> to vector<1x1x1x8x128xf32>
    tpu.vector_store %arg4[%c0_35, %c0_36, %c2_37, %c0_38, %c0_39], %49 {strides = array<i32>} : memref<1x1x3x8x128xf32, #tpu.memory_space<vmem>>, vector<1x1x1x8x128xf32>,
    return
  }
  func.func @transform_0(%arg0: i32, %arg1: i32) -> (i32, i32, i32, i32) {
    %c0_i32 = arith.constant 0 : i32
    %c0_i32_0 = arith.constant 0 : i32
    %c0_i32_1 = arith.constant 0 : i32
    return %arg0, %c0_i32, %arg1, %c0_i32_0 : i32, i32, i32, i32
  }
  func.func @transform_1(%arg0: i32, %arg1: i32) -> (i32, i32, i32, i32) {
    %c0_i32 = arith.constant 0 : i32
    %c0_i32_0 = arith.constant 0 : i32
    %c0_i32_1 = arith.constant 0 : i32
    return %arg0, %c0_i32, %arg1, %c0_i32_0 : i32, i32, i32, i32
  }
  func.func @transform_2(%arg0: i32, %arg1: i32) -> (i32, i32, i32, i32, i32) {
    %c0_i32 = arith.constant 0 : i32
    %c0_i32_0 = arith.constant 0 : i32
    %c0_i32_1 = arith.constant 0 : i32
    %c0_i32_2 = arith.constant 0 : i32
    %c0_i32_3 = arith.constant 0 : i32
    return %arg0, %c0_i32, %c0_i32_0, %c0_i32_1, %c0_i32_2 : i32, i32, i32, i32, i32
  }
}

</mosaic_0001>

<bundles_post_ra>
// kernel: dice_loss.1
= control target key start
LH: loop header
LB: loop body
LE: loop exit
PB: predicated region body
PF: predicated region fallthrough
CT: control target
= control target key end

     0   :  { %s420_s9 = smov 0   ;;  %s422_s10 = smov 0   ;;  %s456_s0 = inlined_call_operand.vmem [shape: f32[2,1,2,128], index: 0, kind: input, shape index: {}]   ;;  %s457_s1 = inlined_call_operand.vmem [shape: f32[2,1,2,128], index: 1, kind: input, shape index: {}]   ;;  %s458_s2 = inlined_call_operand.vmem [shape: f32[2,1,3,8,128], index: 2, kind: output, shape index: {}]  }
   0x1   :  { %s424_s11 = smov 0  }
   0x2 LB: > { %s24_s12 = sadd.s32 1, %s399_s10  ;;  %p345_p0 = scmp.ge.s32.totalorder %s403_s11, 1  ;;  %s403_s11 = sphi %s424_s11, %s12_s11   ;;  %s399_s10 = sphi %s422_s10, %s460_s10   ;;  %s395_s9 = sphi %s420_s9, %s459_s9  }
   0x3   : > { %p26_p1 = scmp.ge.s32.totalorder %s24_s12, 2  ;;  %p154_p2 = scmp.lt.s32.totalorder %s403_s11, 3 }
   0x5   : > { %s462_s12 = smov (%p26_p1, %s24_s12), 0  ;;  %p155_p3 = pnand %p345_p0, %p154_p2 }
   0x6   : > { %p194_p4 = scmp.lt.s32.totalorder (!%p155_p3), %s395_s9, 1 }
   0x7   : > { %158 = sbr.rel (%p155_p3) target bundleno = 27 (0x1b), region = 28 }
   0xc   : > { %v231_v0 = vlaneseq  ;;  %s464_s9 = smov (!%p194_p4, %s395_s9), 1 }
   0xd   : > { %s346_s13 = sshll.u32 %s464_s9, 1  ;;  %s355_s20 = smul.u32 24, %s464_s9 }
   0xe   : > { %v232_v1 = vshrl.u32 %v231_v0, 7  ;;  %v234_v2 = vand.u32 127, %v231_v0  ;;  %s200_s16 = scalar_lea.vmem %s456_s0, %s346_s13  ;;  %s213_s19 = scalar_lea.vmem %s457_s1, %s346_s13 }
   0xf   : > { %v229_v4 = vld [vmem:[%s200_s16] sm:$0xff]  ;;  %s221_s23 = scalar_lea.vmem %s458_s2, %s355_s20 }
  0x10   : > { %v236_v3 = vmul.u32 128, %v232_v1  ;;  %v230_v5 = vld [vmem:[%s213_s19] sm:$0xff] }
  0x12   : > { %v239_v6 = vadd.s32 %v236_v3, %v234_v2 }
  0x14   : > { %vm240_vm0 = vcmp.lt.s32.totalorder %v239_v6, 256 }
  0x15   : > { %v241_v7 = vsel %vm240_vm0, %v229_v4, 0.0  ;;  %v242_v8 = vsel %vm240_vm0, %v230_v5, 0.0 }
  0x16   : > { %v243_v9 = vmul.f32 %v242_v8, %v241_v7  ;;  %v245_v10 = vmul.f32 %v241_v7, %v241_v7  ;;  %v247_v11 = vmul.f32 %v242_v8, %v242_v8 }
  0x18   : > { %251 = vst [vmem:[%s221_s23] sm:$0xff] %v243_v9 }
  0x19   : > { %350 = vst [vmem:[%s221_s23 + $0x8] sm:$0xff] %v245_v10 }
  0x1a   : > { %352 = vst [vmem:[%s221_s23 + $0x10] sm:$0xff] %v247_v11 }
  0x1b PF: > { %s12_s11 = sadd.s32 1, %s403_s11   ;;  %s459_s9 = smov %s399_s10 }
  0x1c   : > { %p9_p5 = scmp.ge.s32.totalorder %s12_s11, 4   ;;  %s460_s10 = smov %s462_s12 }
  0x1e   :  { %11 = sbr.rel (!%p9_p5) target bundleno = 2 (0x2), region = 67 }

</bundles_post_ra>
